<compile_context>
chip_gen: v7x
topology: tpu7x:2x2x1
jax: 0.10.0
libtpu: 0.0.40
codegen_flags: <defaults>
</compile_context>

<pallas_src>
import functools

import jax
import jax.numpy as jnp
from jax import lax
from jax.experimental import pallas as pl
from jax.experimental.pallas import tpu as pltpu

_MAX_UNROLL = 64  # chunks up to this many timesteps are fully unrolled in-kernel


def lstm_fc_softmax_kernel(x_ref, w_ih_ref, w_hh_ref, b_ref, w_fc_ref, b_fc_ref,
                           out_ref, ig_ref, h_ref, c_ref):
    # x_ref:    (B, Tt, D)   batch-first time chunk (auto-DMA'd / double-buffered)
    # w_ih_ref: (D, 4H)      input->gates weights (PyTorch weight_ih_l0 transposed)
    # w_hh_ref: (H, 4H)      hidden->gates weights (PyTorch weight_hh_l0 transposed)
    # b_ref:    (1, 4H)      bias_ih + bias_hh (f32)
    # w_fc_ref: (H, O)       fc weight transposed
    # b_fc_ref: (1, O)       fc bias
    # out_ref:  (B, O)       softmax(axis=batch) of fc(h_last); written on last chunk
    # ig_ref:   (Tt, B, 4H)  VMEM scratch: hoisted input projection, time-major
    # h_ref/c_ref: (B, H)    VMEM scratch: LSTM state carried across grid steps
    B, Tt, D = x_ref.shape
    H = w_hh_ref.shape[0]
    chunk = pl.program_id(0)

    # ---- first chunk: zero the carried state --------------------------------
    @pl.when(chunk == 0)
    def _():
        h_ref[...] = jnp.zeros_like(h_ref)
        c_ref[...] = jnp.zeros_like(c_ref)

    # ---- hoisted input projection (no serial dependency) --------------------
    # One (Tt, D) x (D, 4H) MXU matmul per batch row per chunk (instead of T tiny
    # per-step matmuls), written time-major so the recurrence only needs a cheap
    # leading-axis read ig_ref[t]. Accumulation stays f32 via preferred_element_type.
    w_ih = w_ih_ref[...]
    bias = b_ref[...]
    for bb in range(B):  # B is small and static; all indices here are static
        ig_ref[:, bb, :] = (
            jnp.dot(x_ref[bb], w_ih, preferred_element_type=jnp.float32) + bias)

    # ---- serial recurrence over the chunk ------------------------------------
    w_hh = w_hh_ref[...]

    def step(t, carry):
        h, c = carry
        gates = ig_ref[t] + jnp.dot(h.astype(w_hh.dtype), w_hh,
                                    preferred_element_type=jnp.float32)   # (B, 4H)
        # PyTorch LSTM gate order: i, f, g, o.  Gate math stays in f32 (v5e-safe).
        # TODO(synk): for real model sizes make H a multiple of 128 (or pad each gate
        # to 128 lanes) so these slices are whole-vreg instead of masked lane selects.
        i = jax.nn.sigmoid(gates[:, 0:H])
        f = jax.nn.sigmoid(gates[:, H:2 * H])
        g = jnp.tanh(gates[:, 2 * H:3 * H])
        o = jax.nn.sigmoid(gates[:, 3 * H:4 * H])
        c_new = f * c + i * g
        h_new = o * jnp.tanh(c_new)
        return h_new, c_new

    h = h_ref[...]
    c = c_ref[...]
    if Tt <= _MAX_UNROLL:
        # Full unroll: gives the LLO scheduler visibility across timesteps.
        for t in range(Tt):
            h, c = step(t, (h, c))
    else:
        # Rare fallback (T had no multiple-of-8 divisor): visible loop, partial unroll.
        h, c = lax.fori_loop(0, Tt, step, (h, c), unroll=8)
    h_ref[...] = h
    c_ref[...] = c

    # ---- last chunk: fc + softmax over the batch axis -------------------------
    @pl.when(chunk == pl.num_programs(0) - 1)
    def _():
        # Dropout is identity in eval mode.
        logits = (jnp.dot(h.astype(w_fc_ref.dtype), w_fc_ref[...],
                          preferred_element_type=jnp.float32) + b_fc_ref[...])  # (B, O)
        # Legacy nn.Softmax(dim=None) on a 3-D tensor normalizes over dim 0 (batch).
        m = jnp.max(logits, axis=0, keepdims=True)
        e = jnp.exp(logits - m)
        denom = jnp.sum(e, axis=0, keepdims=True)
        # approx=True would move the reciprocal to the free EUP slot, but perturbs the
        # probabilities by ~1e-4; keep it exact to preserve the module's semantics
        # (flip to approx=True if O grows and tolerance allows).
        out_ref[...] = e * pl.reciprocal(denom, approx=False)


def _pick_time_chunk(T, cap):
    """Largest multiple-of-8 divisor of T that is <= cap (sublane-aligned chunks);
    falls back to T (single chunk) if none exists."""
    best = None
    c = 8
    while c <= min(cap, T):
        if T % c == 0:
            best = c
        c += 8
    return best if best is not None else T


def rnn_forward(x, params, *, time_chunk=_MAX_UNROLL, matmul_dtype=jnp.float32):
    """x: (B, T, D) float32, batch_first (as in the PyTorch module). Returns (B, O).

    matmul_dtype: pass jnp.bfloat16 on v6e/v7x to feed the MXU at full rate (gate
    math and accumulation stay f32); default f32 keeps bit-level parity with PyTorch.
    """
    B, T, D = x.shape
    H = params["w_hh"].shape[1]
    O = params["w_fc"].shape[0]
    G = 4 * H

    Tt = _pick_time_chunk(T, time_chunk)
    n_chunks = T // Tt

    # Weights are pre-transposed so every in-kernel matmul is a plain rows x cols dot.
    w_ih = params["w_ih"].T.astype(matmul_dtype)                    # (D, 4H)
    w_hh = params["w_hh"].T.astype(matmul_dtype)                    # (H, 4H)
    bias = (params["b_ih"] + params["b_hh"]).reshape(1, G).astype(jnp.float32)
    w_fc = params["w_fc"].T.astype(matmul_dtype)                    # (H, O)
    b_fc = params["b_fc"].reshape(1, O).astype(jnp.float32)
    x_in = x.astype(matmul_dtype)

    flops = 2 * T * B * (D + H) * G + 2 * B * H * O
    transcendentals = T * B * 5 * H + B * O
    bytes_accessed = (x_in.size * x_in.dtype.itemsize
                      + w_ih.size * w_ih.dtype.itemsize
                      + w_hh.size * w_hh.dtype.itemsize
                      + w_fc.size * w_fc.dtype.itemsize
                      + bias.size * 4 + b_fc.size * 4 + B * O * 4)

    out = pl.pallas_call(
        lstm_fc_softmax_kernel,
        out_shape=jax.ShapeDtypeStruct((B, O), jnp.float32),
        grid=(n_chunks,),
        in_specs=[
            pl.BlockSpec((B, Tt, D), lambda t: (0, t, 0)),   # time chunk of x
            pl.BlockSpec((D, G), lambda t: (0, 0)),          # weights: resident block
            pl.BlockSpec((H, G), lambda t: (0, 0)),
            pl.BlockSpec((1, G), lambda t: (0, 0)),
            pl.BlockSpec((H, O), lambda t: (0, 0)),
            pl.BlockSpec((1, O), lambda t: (0, 0)),
        ],
        out_specs=pl.BlockSpec((B, O), lambda t: (0, 0)),    # resident; written last
        scratch_shapes=[
            pltpu.VMEM((Tt, B, G), jnp.float32),             # hoisted input projection
            pltpu.VMEM((B, H), jnp.float32),                 # h carry
            pltpu.VMEM((B, H), jnp.float32),                 # c carry
        ],
        compiler_params=pltpu.CompilerParams(
            dimension_semantics=("arbitrary",),              # time recurrence is serial
            vmem_limit_bytes=32 * 1024 * 1024,               # chunk-bounded working set
        ),
        cost_estimate=pl.CostEstimate(
            flops=int(flops),
            transcendentals=int(transcendentals),
            bytes_accessed=int(bytes_accessed)),
    )(x_in, w_ih, w_hh, bias, w_fc, b_fc)

    # torch.squeeze(fc_output[:, -1, :])
    return jnp.squeeze(out)


def init_params(key, input_dim, hidden_dim, output_dim):
    """Deterministic init mirroring the PyTorch module's parameter shapes."""
    k = 1.0 / jnp.sqrt(hidden_dim)
    ks = jax.random.split(key, 6)
    w_ih = jax.random.uniform(ks[0], (4 * hidden_dim, input_dim), jnp.float32, -k, k)
    w_hh = jax.random.uniform(ks[1], (4 * hidden_dim, hidden_dim), jnp.float32, -k, k)
    b_ih = jax.random.uniform(ks[2], (4 * hidden_dim,), jnp.float32, -k, k)
    b_hh = jax.random.uniform(ks[3], (4 * hidden_dim,), jnp.float32, -k, k)
    w_fc = jax.random.uniform(ks[4], (output_dim, hidden_dim), jnp.float32, -k, k)
    b_fc = jax.random.uniform(ks[5], (output_dim,), jnp.float32, -k, k)
    return dict(w_ih=w_ih, w_hh=w_hh, b_ih=b_ih, b_hh=b_hh, w_fc=w_fc, b_fc=b_fc)


def rnn_reference(x, params):
    """Pure-JAX reference mirroring the PyTorch forward (eval mode)."""
    B, T, D = x.shape
    H = params["w_hh"].shape[1]
    dot = functools.partial(jnp.dot, precision=lax.Precision.HIGHEST,
                            preferred_element_type=jnp.float32)
    w_ih = params["w_ih"].T
    w_hh = params["w_hh"].T
    bias = params["b_ih"] + params["b_hh"]
    h = jnp.zeros((B, H), jnp.float32)
    c = jnp.zeros((B, H), jnp.float32)
    hs = []
    for t in range(T):
        gates = dot(x[:, t, :], w_ih) + dot(h, w_hh) + bias
        i = jax.nn.sigmoid(gates[:, 0:H])
        f = jax.nn.sigmoid(gates[:, H:2 * H])
        g = jnp.tanh(gates[:, 2 * H:3 * H])
        o = jax.nn.sigmoid(gates[:, 3 * H:4 * H])
        c = f * c + i * g
        h = o * jnp.tanh(c)
        hs.append(h)
    r_out = jnp.stack(hs, axis=1)                         # (B, T, H)
    fc = dot(r_out, params["w_fc"].T) + params["b_fc"]    # (B, T, O)
    sm = jax.nn.softmax(fc, axis=0)                       # nn.Softmax(dim=None), 3-D -> dim 0
    return jnp.squeeze(sm[:, -1, :])


# TODO(synk): bidirectional / num_layers > 1 / GRU cell variants of the module are not
# implemented; this kernel covers the LSTM, 1-layer, unidirectional configuration.
# (self.layer_norm / self.activation are defined but unused in the PyTorch forward;
# dropout is identity in eval mode.)
# TODO(synk): for large batches, add a leading "parallel" batch grid axis (the
# recurrence is independent per sequence) to use both v7x TensorCores; at B=2 the
# kernel is latency-bound on the serial recurrence regardless of generation.

if __name__ == "__main__":
    batch, seq_length, input_dim, hidden_dim, output_dim = 2, 16, 8, 32, 4

    key = jax.random.PRNGKey(0)
    k_x, k_p = jax.random.split(key)
    x = jax.random.normal(k_x, (batch, seq_length, input_dim), jnp.float32)
    params = init_params(k_p, input_dim, hidden_dim, output_dim)

    out = rnn_forward(x, params, time_chunk=8)   # -> grid of 2 time chunks
    jax.block_until_ready(out)
    assert out.shape == (batch, output_dim)

    ref = rnn_reference(x, params)
    err = float(jnp.max(jnp.abs(out - ref)))
    assert err < 5e-3, f"kernel vs reference mismatch: {err}"
    print("KERNEL_OK")
</pallas_src>

<mosaic_0001>
module attributes {stable_mosaic.version = 11 : i64} {
  func.func @lstm_fc_softmax_kernel(%arg0: i32, %arg1: memref<2x8x8xf32, #tpu.memory_space<vmem>>, %arg2: memref<8x128xf32, #tpu.memory_space<vmem>>, %arg3: memref<32x128xf32, #tpu.memory_space<vmem>>, %arg4: memref<1x128xf32, #tpu.memory_space<vmem>>, %arg5: memref<32x4xf32, #tpu.memory_space<vmem>>, %arg6: memref<1x4xf32, #tpu.memory_space<vmem>>, %arg7: memref<2x4xf32, #tpu.memory_space<vmem>>, %arg8: memref<8x2x128xf32, #tpu.memory_space<vmem>>, %arg9: memref<2x32xf32, #tpu.memory_space<vmem>>, %arg10: memref<2x32xf32, #tpu.memory_space<vmem>>) attributes {dimension_semantics = [#tpu.dimension_semantics<arbitrary>], iteration_bounds = array<i64: 2>, scalar_prefetch = 0 : i64, scratch_operands = 3 : i64, tpu.core_type = #tpu.core_type<tc>, window_params = [{transform_indices = @transform_0, window_bounds = array<i64: 2, 8, 8>}, {pipeline_mode = #tpu.pipeline_mode<synchronous>, transform_indices = @transform_1, window_bounds = array<i64: 8, 128>}, {pipeline_mode = #tpu.pipeline_mode<synchronous>, transform_indices = @transform_2, window_bounds = array<i64: 32, 128>}, {pipeline_mode = #tpu.pipeline_mode<synchronous>, transform_indices = @transform_3, window_bounds = array<i64: 1, 128>}, {pipeline_mode = #tpu.pipeline_mode<synchronous>, transform_indices = @transform_4, window_bounds = array<i64: 32, 4>}, {pipeline_mode = #tpu.pipeline_mode<synchronous>, transform_indices = @transform_5, window_bounds = array<i64: 1, 4>}, {pipeline_mode = #tpu.pipeline_mode<synchronous>, transform_indices = @transform_6, window_bounds = array<i64: 2, 4>}]} {
    %c0_i32 = arith.constant 0 : i32
    %0 = arith.cmpi eq, %arg0, %c0_i32 : i32
    %1 = arith.extui %0 : i1 to i32
    %c0_i32_0 = arith.constant 0 : i32
    %2 = arith.cmpi ne, %1, %c0_i32_0 : i32
    scf.if %2 {
      %cst_77 = arith.constant 0.000000e+00 : f32
      %261 = vector.broadcast %cst_77 : f32 to vector<2x32xf32>
      %c0_78 = arith.constant 0 : index
      %c0_79 = arith.constant 0 : index
      %262 = vector.load %arg9[%c0_78, %c0_79] : memref<2x32xf32, #tpu.memory_space<vmem>>, vector<2x32xf32>
      tpu.vector_store %arg9[%c0_78, %c0_79], %261 {strides = array<i32>} : memref<2x32xf32, #tpu.memory_space<vmem>>, vector<2x32xf32>,
      %cst_80 = arith.constant 0.000000e+00 : f32
      %263 = vector.broadcast %cst_80 : f32 to vector<2x32xf32>
      %c0_81 = arith.constant 0 : index
      %c0_82 = arith.constant 0 : index
      %264 = vector.load %arg10[%c0_81, %c0_82] : memref<2x32xf32, #tpu.memory_space<vmem>>, vector<2x32xf32>
      tpu.vector_store %arg10[%c0_81, %c0_82], %263 {strides = array<i32>} : memref<2x32xf32, #tpu.memory_space<vmem>>, vector<2x32xf32>,
    } else {
    }
    %c0 = arith.constant 0 : index
    %c0_1 = arith.constant 0 : index
    %3 = vector.load %arg2[%c0, %c0_1] : memref<8x128xf32, #tpu.memory_space<vmem>>, vector<8x128xf32>
    %c0_2 = arith.constant 0 : index
    %c0_3 = arith.constant 0 : index
    %4 = vector.load %arg4[%c0_2, %c0_3] : memref<1x128xf32, #tpu.memory_space<vmem>>, vector<1x128xf32>
    %c0_4 = arith.constant 0 : index
    %c0_5 = arith.constant 0 : index
    %c0_6 = arith.constant 0 : index
    %5 = vector.load %arg1[%c0_4, %c0_5, %c0_6] : memref<2x8x8xf32, #tpu.memory_space<vmem>>, vector<1x8x8xf32>
    %6 = vector.shape_cast %5 : vector<1x8x8xf32> to vector<8x8xf32>
    %cst = arith.constant dense<0.000000e+00> : vector<8x128xf32>
    %7 = tpu.matmul %6, %3, %cst {dimension_numbers = #tpu.dot_dimension_numbers<[1], [0], [0], [1], [0, 0, 1, 1], [], []>} : vector<8x8xf32>, vector<8x128xf32>, vector<8x128xf32> -> vector<8x128xf32>
    %8 = vector.broadcast %4 : vector<1x128xf32> to vector<8x128xf32>
    %9 = arith.addf %7, %8 : vector<8x128xf32>
    %c0_7 = arith.constant 0 : index
    %c0_8 = arith.constant 0 : index
    %c0_9 = arith.constant 0 : index
    %10 = vector.load %arg8[%c0_7, %c0_8, %c0_9] : memref<8x2x128xf32, #tpu.memory_space<vmem>>, vector<8x1x128xf32>
    %11 = vector.shape_cast %10 : vector<8x1x128xf32> to vector<8x128xf32>
    %12 = vector.shape_cast %9 : vector<8x128xf32> to vector<8x1x128xf32>
    tpu.vector_store %arg8[%c0_7, %c0_8, %c0_9], %12 {strides = array<i32>} : memref<8x2x128xf32, #tpu.memory_space<vmem>>, vector<8x1x128xf32>,
    %c1 = arith.constant 1 : index
    %c0_10 = arith.constant 0 : index
    %c0_11 = arith.constant 0 : index
    %13 = vector.load %arg1[%c1, %c0_10, %c0_11] : memref<2x8x8xf32, #tpu.memory_space<vmem>>, vector<1x8x8xf32>
    %14 = vector.shape_cast %13 : vector<1x8x8xf32> to vector<8x8xf32>
    %cst_12 = arith.constant dense<0.000000e+00> : vector<8x128xf32>
    %15 = tpu.matmul %14, %3, %cst_12 {dimension_numbers = #tpu.dot_dimension_numbers<[1], [0], [0], [1], [0, 0, 1, 1], [], []>} : vector<8x8xf32>, vector<8x128xf32>, vector<8x128xf32> -> vector<8x128xf32>
    %16 = vector.broadcast %4 : vector<1x128xf32> to vector<8x128xf32>
    %17 = arith.addf %15, %16 : vector<8x128xf32>
    %c0_13 = arith.constant 0 : index
    %c1_14 = arith.constant 1 : index
    %c0_15 = arith.constant 0 : index
    %18 = vector.load %arg8[%c0_13, %c1_14, %c0_15] : memref<8x2x128xf32, #tpu.memory_space<vmem>>, vector<8x1x128xf32>
    %19 = vector.shape_cast %18 : vector<8x1x128xf32> to vector<8x128xf32>
    %20 = vector.shape_cast %17 : vector<8x128xf32> to vector<8x1x128xf32>
    tpu.vector_store %arg8[%c0_13, %c1_14, %c0_15], %20 {strides = array<i32>} : memref<8x2x128xf32, #tpu.memory_space<vmem>>, vector<8x1x128xf32>,
    %c0_16 = arith.constant 0 : index
    %c0_17 = arith.constant 0 : index
    %21 = vector.load %arg3[%c0_16, %c0_17] : memref<32x128xf32, #tpu.memory_space<vmem>>, vector<32x128xf32>
    %c0_18 = arith.constant 0 : index
    %c0_19 = arith.constant 0 : index
    %22 = vector.load %arg9[%c0_18, %c0_19] : memref<2x32xf32, #tpu.memory_space<vmem>>, vector<2x32xf32>
    %c0_20 = arith.constant 0 : index
    %c0_21 = arith.constant 0 : index
    %23 = vector.load %arg10[%c0_20, %c0_21] : memref<2x32xf32, #tpu.memory_space<vmem>>, vector<2x32xf32>
    %c0_22 = arith.constant 0 : index
    %c0_23 = arith.constant 0 : index
    %c0_24 = arith.constant 0 : index
    %24 = vector.load %arg8[%c0_22, %c0_23, %c0_24] : memref<8x2x128xf32, #tpu.memory_space<vmem>>, vector<1x2x128xf32>
    %25 = vector.shape_cast %24 : vector<1x2x128xf32> to vector<2x128xf32>
    %cst_25 = arith.constant dense<0.000000e+00> : vector<2x128xf32>
    %26 = tpu.matmul %22, %21, %cst_25 {dimension_numbers = #tpu.dot_dimension_numbers<[1], [0], [0], [1], [0, 0, 1, 1], [], []>} : vector<2x32xf32>, vector<32x128xf32>, vector<2x128xf32> -> vector<2x128xf32>
    %27 = arith.addf %25, %26 : vector<2x128xf32>
    %28 = vector.extract_strided_slice %27 {offsets = [0, 0], sizes = [2, 32], strides = [1, 1]} : vector<2x128xf32> to vector<2x32xf32>
    %29 = arith.negf %28 : vector<2x32xf32>
    %30 = math.exp %29 : vector<2x32xf32>
    %cst_26 = arith.constant 1.000000e+00 : f32
    %31 = vector.broadcast %cst_26 : f32 to vector<2x32xf32>
    %32 = arith.addf %31, %30 : vector<2x32xf32>
    %33 = arith.divf %31, %32 : vector<2x32xf32>
    %34 = vector.extract_strided_slice %27 {offsets = [0, 32], sizes = [2, 32], strides = [1, 1]} : vector<2x128xf32> to vector<2x32xf32>
    %35 = arith.negf %34 : vector<2x32xf32>
    %36 = math.exp %35 : vector<2x32xf32>
    %cst_27 = arith.constant 1.000000e+00 : f32
    %37 = vector.broadcast %cst_27 : f32 to vector<2x32xf32>
    %38 = arith.addf %37, %36 : vector<2x32xf32>
    %39 = arith.divf %37, %38 : vector<2x32xf32>
    %40 = vector.extract_strided_slice %27 {offsets = [0, 64], sizes = [2, 32], strides = [1, 1]} : vector<2x128xf32> to vector<2x32xf32>
    %41 = math.tanh %40 : vector<2x32xf32>
    %42 = vector.extract_strided_slice %27 {offsets = [0, 96], sizes = [2, 32], strides = [1, 1]} : vector<2x128xf32> to vector<2x32xf32>
    %43 = arith.negf %42 : vector<2x32xf32>
    %44 = math.exp %43 : vector<2x32xf32>
    %cst_28 = arith.constant 1.000000e+00 : f32
    %45 = vector.broadcast %cst_28 : f32 to vector<2x32xf32>
    %46 = arith.addf %45, %44 : vector<2x32xf32>
    %47 = arith.divf %45, %46 : vector<2x32xf32>
    %48 = arith.mulf %39, %23 : vector<2x32xf32>
    %49 = arith.mulf %33, %41 : vector<2x32xf32>
    %50 = arith.addf %48, %49 : vector<2x32xf32>
    %51 = math.tanh %50 : vector<2x32xf32>
    %52 = arith.mulf %47, %51 : vector<2x32xf32>
    %c1_29 = arith.constant 1 : index
    %c0_30 = arith.constant 0 : index
    %c0_31 = arith.constant 0 : index
    %53 = vector.load %arg8[%c1_29, %c0_30, %c0_31] : memref<8x2x128xf32, #tpu.memory_space<vmem>>, vector<1x2x128xf32>
    %54 = vector.shape_cast %53 : vector<1x2x128xf32> to vector<2x128xf32>
    %cst_32 = arith.constant dense<0.000000e+00> : vector<2x128xf32>
    %55 = tpu.matmul %52, %21, %cst_32 {dimension_numbers = #tpu.dot_dimension_numbers<[1], [0], [0], [1], [0, 0, 1, 1], [], []>} : vector<2x32xf32>, vector<32x128xf32>, vector<2x128xf32> -> vector<2x128xf32>
    %56 = arith.addf %54, %55 : vector<2x128xf32>
    %57 = vector.extract_strided_slice %56 {offsets = [0, 0], sizes = [2, 32], strides = [1, 1]} : vector<2x128xf32> to vector<2x32xf32>
    %58 = arith.negf %57 : vector<2x32xf32>
    %59 = math.exp %58 : vector<2x32xf32>
    %cst_33 = arith.constant 1.000000e+00 : f32
    %60 = vector.broadcast %cst_33 : f32 to vector<2x32xf32>
    %61 = arith.addf %60, %59 : vector<2x32xf32>
    %62 = arith.divf %60, %61 : vector<2x32xf32>
    %63 = vector.extract_strided_slice %56 {offsets = [0, 32], sizes = [2, 32], strides = [1, 1]} : vector<2x128xf32> to vector<2x32xf32>
    %64 = arith.negf %63 : vector<2x32xf32>
    %65 = math.exp %64 : vector<2x32xf32>
    %cst_34 = arith.constant 1.000000e+00 : f32
    %66 = vector.broadcast %cst_34 : f32 to vector<2x32xf32>
    %67 = arith.addf %66, %65 : vector<2x32xf32>
    %68 = arith.divf %66, %67 : vector<2x32xf32>
    %69 = vector.extract_strided_slice %56 {offsets = [0, 64], sizes = [2, 32], strides = [1, 1]} : vector<2x128xf32> to vector<2x32xf32>
    %70 = math.tanh %69 : vector<2x32xf32>
    %71 = vector.extract_strided_slice %56 {offsets = [0, 96], sizes = [2, 32], strides = [1, 1]} : vector<2x128xf32> to vector<2x32xf32>
    %72 = arith.negf %71 : vector<2x32xf32>
    %73 = math.exp %72 : vector<2x32xf32>
    %cst_35 = arith.constant 1.000000e+00 : f32
    %74 = vector.broadcast %cst_35 : f32 to vector<2x32xf32>
    %75 = arith.addf %74, %73 : vector<2x32xf32>
    %76 = arith.divf %74, %75 : vector<2x32xf32>
    %77 = arith.mulf %68, %50 : vector<2x32xf32>
    %78 = arith.mulf %62, %70 : vector<2x32xf32>
    %79 = arith.addf %77, %78 : vector<2x32xf32>
    %80 = math.tanh %79 : vector<2x32xf32>
    %81 = arith.mulf %76, %80 : vector<2x32xf32>
    %c2 = arith.constant 2 : index
    %c0_36 = arith.constant 0 : index
    %c0_37 = arith.constant 0 : index
    %82 = vector.load %arg8[%c2, %c0_36, %c0_37] : memref<8x2x128xf32, #tpu.memory_space<vmem>>, vector<1x2x128xf32>
    %83 = vector.shape_cast %82 : vector<1x2x128xf32> to vector<2x128xf32>
    %cst_38 = arith.constant dense<0.000000e+00> : vector<2x128xf32>
    %84 = tpu.matmul %81, %21, %cst_38 {dimension_numbers = #tpu.dot_dimension_numbers<[1], [0], [0], [1], [0, 0, 1, 1], [], []>} : vector<2x32xf32>, vector<32x128xf32>, vector<2x128xf32> -> vector<2x128xf32>
    %85 = arith.addf %83, %84 : vector<2x128xf32>
    %86 = vector.extract_strided_slice %85 {offsets = [0, 0], sizes = [2, 32], strides = [1, 1]} : vector<2x128xf32> to vector<2x32xf32>
    %87 = arith.negf %86 : vector<2x32xf32>
    %88 = math.exp %87 : vector<2x32xf32>
    %cst_39 = arith.constant 1.000000e+00 : f32
    %89 = vector.broadcast %cst_39 : f32 to vector<2x32xf32>
    %90 = arith.addf %89, %88 : vector<2x32xf32>
    %91 = arith.divf %89, %90 : vector<2x32xf32>
    %92 = vector.extract_strided_slice %85 {offsets = [0, 32], sizes = [2, 32], strides = [1, 1]} : vector<2x128xf32> to vector<2x32xf32>
    %93 = arith.negf %92 : vector<2x32xf32>
    %94 = math.exp %93 : vector<2x32xf32>
    %cst_40 = arith.constant 1.000000e+00 : f32
    %95 = vector.broadcast %cst_40 : f32 to vector<2x32xf32>
    %96 = arith.addf %95, %94 : vector<2x32xf32>
    %97 = arith.divf %95, %96 : vector<2x32xf32>
    %98 = vector.extract_strided_slice %85 {offsets = [0, 64], sizes = [2, 32], strides = [1, 1]} : vector<2x128xf32> to vector<2x32xf32>
    %99 = math.tanh %98 : vector<2x32xf32>
    %100 = vector.extract_strided_slice %85 {offsets = [0, 96], sizes = [2, 32], strides = [1, 1]} : vector<2x128xf32> to vector<2x32xf32>
    %101 = arith.negf %100 : vector<2x32xf32>
    %102 = math.exp %101 : vector<2x32xf32>
    %cst_41 = arith.constant 1.000000e+00 : f32
    %103 = vector.broadcast %cst_41 : f32 to vector<2x32xf32>
    %104 = arith.addf %103, %102 : vector<2x32xf32>
    %105 = arith.divf %103, %104 : vector<2x32xf32>
    %106 = arith.mulf %97, %79 : vector<2x32xf32>
    %107 = arith.mulf %91, %99 : vector<2x32xf32>
    %108 = arith.addf %106, %107 : vector<2x32xf32>
    %109 = math.tanh %108 : vector<2x32xf32>
    %110 = arith.mulf %105, %109 : vector<2x32xf32>
    %c3 = arith.constant 3 : index
    %c0_42 = arith.constant 0 : index
    %c0_43 = arith.constant 0 : index
    %111 = vector.load %arg8[%c3, %c0_42, %c0_43] : memref<8x2x128xf32, #tpu.memory_space<vmem>>, vector<1x2x128xf32>
    %112 = vector.shape_cast %111 : vector<1x2x128xf32> to vector<2x128xf32>
    %cst_44 = arith.constant dense<0.000000e+00> : vector<2x128xf32>
    %113 = tpu.matmul %110, %21, %cst_44 {dimension_numbers = #tpu.dot_dimension_numbers<[1], [0], [0], [1], [0, 0, 1, 1], [], []>} : vector<2x32xf32>, vector<32x128xf32>, vector<2x128xf32> -> vector<2x128xf32>
    %114 = arith.addf %112, %113 : vector<2x128xf32>
    %115 = vector.extract_strided_slice %114 {offsets = [0, 0], sizes = [2, 32], strides = [1, 1]} : vector<2x128xf32> to vector<2x32xf32>
    %116 = arith.negf %115 : vector<2x32xf32>
    %117 = math.exp %116 : vector<2x32xf32>
    %cst_45 = arith.constant 1.000000e+00 : f32
    %118 = vector.broadcast %cst_45 : f32 to vector<2x32xf32>
    %119 = arith.addf %118, %117 : vector<2x32xf32>
    %120 = arith.divf %118, %119 : vector<2x32xf32>
    %121 = vector.extract_strided_slice %114 {offsets = [0, 32], sizes = [2, 32], strides = [1, 1]} : vector<2x128xf32> to vector<2x32xf32>
    %122 = arith.negf %121 : vector<2x32xf32>
    %123 = math.exp %122 : vector<2x32xf32>
    %cst_46 = arith.constant 1.000000e+00 : f32
    %124 = vector.broadcast %cst_46 : f32 to vector<2x32xf32>
    %125 = arith.addf %124, %123 : vector<2x32xf32>
    %126 = arith.divf %124, %125 : vector<2x32xf32>
    %127 = vector.extract_strided_slice %114 {offsets = [0, 64], sizes = [2, 32], strides = [1, 1]} : vector<2x128xf32> to vector<2x32xf32>
    %128 = math.tanh %127 : vector<2x32xf32>
    %129 = vector.extract_strided_slice %114 {offsets = [0, 96], sizes = [2, 32], strides = [1, 1]} : vector<2x128xf32> to vector<2x32xf32>
    %130 = arith.negf %129 : vector<2x32xf32>
    %131 = math.exp %130 : vector<2x32xf32>
    %cst_47 = arith.constant 1.000000e+00 : f32
    %132 = vector.broadcast %cst_47 : f32 to vector<2x32xf32>
    %133 = arith.addf %132, %131 : vector<2x32xf32>
    %134 = arith.divf %132, %133 : vector<2x32xf32>
    %135 = arith.mulf %126, %108 : vector<2x32xf32>
    %136 = arith.mulf %120, %128 : vector<2x32xf32>
    %137 = arith.addf %135, %136 : vector<2x32xf32>
    %138 = math.tanh %137 : vector<2x32xf32>
    %139 = arith.mulf %134, %138 : vector<2x32xf32>
    %c4 = arith.constant 4 : index
    %c0_48 = arith.constant 0 : index
    %c0_49 = arith.constant 0 : index
    %140 = vector.load %arg8[%c4, %c0_48, %c0_49] : memref<8x2x128xf32, #tpu.memory_space<vmem>>, vector<1x2x128xf32>
    %141 = vector.shape_cast %140 : vector<1x2x128xf32> to vector<2x128xf32>
    %cst_50 = arith.constant dense<0.000000e+00> : vector<2x128xf32>
    %142 = tpu.matmul %139, %21, %cst_50 {dimension_numbers = #tpu.dot_dimension_numbers<[1], [0], [0], [1], [0, 0, 1, 1], [], []>} : vector<2x32xf32>, vector<32x128xf32>, vector<2x128xf32> -> vector<2x128xf32>
    %143 = arith.addf %141, %142 : vector<2x128xf32>
    %144 = vector.extract_strided_slice %143 {offsets = [0, 0], sizes = [2, 32], strides = [1, 1]} : vector<2x128xf32> to vector<2x32xf32>
    %145 = arith.negf %144 : vector<2x32xf32>
    %146 = math.exp %145 : vector<2x32xf32>
    %cst_51 = arith.constant 1.000000e+00 : f32
    %147 = vector.broadcast %cst_51 : f32 to vector<2x32xf32>
    %148 = arith.addf %147, %146 : vector<2x32xf32>
    %149 = arith.divf %147, %148 : vector<2x32xf32>
    %150 = vector.extract_strided_slice %143 {offsets = [0, 32], sizes = [2, 32], strides = [1, 1]} : vector<2x128xf32> to vector<2x32xf32>
    %151 = arith.negf %150 : vector<2x32xf32>
    %152 = math.exp %151 : vector<2x32xf32>
    %cst_52 = arith.constant 1.000000e+00 : f32
    %153 = vector.broadcast %cst_52 : f32 to vector<2x32xf32>
    %154 = arith.addf %153, %152 : vector<2x32xf32>
    %155 = arith.divf %153, %154 : vector<2x32xf32>
    %156 = vector.extract_strided_slice %143 {offsets = [0, 64], sizes = [2, 32], strides = [1, 1]} : vector<2x128xf32> to vector<2x32xf32>
    %157 = math.tanh %156 : vector<2x32xf32>
    %158 = vector.extract_strided_slice %143 {offsets = [0, 96], sizes = [2, 32], strides = [1, 1]} : vector<2x128xf32> to vector<2x32xf32>
    %159 = arith.negf %158 : vector<2x32xf32>
    %160 = math.exp %159 : vector<2x32xf32>
    %cst_53 = arith.constant 1.000000e+00 : f32
    %161 = vector.broadcast %cst_53 : f32 to vector<2x32xf32>
    %162 = arith.addf %161, %160 : vector<2x32xf32>
    %163 = arith.divf %161, %162 : vector<2x32xf32>
    %164 = arith.mulf %155, %137 : vector<2x32xf32>
    %165 = arith.mulf %149, %157 : vector<2x32xf32>
    %166 = arith.addf %164, %165 : vector<2x32xf32>
    %167 = math.tanh %166 : vector<2x32xf32>
    %168 = arith.mulf %163, %167 : vector<2x32xf32>
    %c5 = arith.constant 5 : index
    %c0_54 = arith.constant 0 : index
    %c0_55 = arith.constant 0 : index
    %169 = vector.load %arg8[%c5, %c0_54, %c0_55] : memref<8x2x128xf32, #tpu.memory_space<vmem>>, vector<1x2x128xf32>
    %170 = vector.shape_cast %169 : vector<1x2x128xf32> to vector<2x128xf32>
    %cst_56 = arith.constant dense<0.000000e+00> : vector<2x128xf32>
    %171 = tpu.matmul %168, %21, %cst_56 {dimension_numbers = #tpu.dot_dimension_numbers<[1], [0], [0], [1], [0, 0, 1, 1], [], []>} : vector<2x32xf32>, vector<32x128xf32>, vector<2x128xf32> -> vector<2x128xf32>
    %172 = arith.addf %170, %171 : vector<2x128xf32>
    %173 = vector.extract_strided_slice %172 {offsets = [0, 0], sizes = [2, 32], strides = [1, 1]} : vector<2x128xf32> to vector<2x32xf32>
    %174 = arith.negf %173 : vector<2x32xf32>
    %175 = math.exp %174 : vector<2x32xf32>
    %cst_57 = arith.constant 1.000000e+00 : f32
    %176 = vector.broadcast %cst_57 : f32 to vector<2x32xf32>
    %177 = arith.addf %176, %175 : vector<2x32xf32>
    %178 = arith.divf %176, %177 : vector<2x32xf32>
    %179 = vector.extract_strided_slice %172 {offsets = [0, 32], sizes = [2, 32], strides = [1, 1]} : vector<2x128xf32> to vector<2x32xf32>
    %180 = arith.negf %179 : vector<2x32xf32>
    %181 = math.exp %180 : vector<2x32xf32>
    %cst_58 = arith.constant 1.000000e+00 : f32
    %182 = vector.broadcast %cst_58 : f32 to vector<2x32xf32>
    %183 = arith.addf %182, %181 : vector<2x32xf32>
    %184 = arith.divf %182, %183 : vector<2x32xf32>
    %185 = vector.extract_strided_slice %172 {offsets = [0, 64], sizes = [2, 32], strides = [1, 1]} : vector<2x128xf32> to vector<2x32xf32>
    %186 = math.tanh %185 : vector<2x32xf32>
    %187 = vector.extract_strided_slice %172 {offsets = [0, 96], sizes = [2, 32], strides = [1, 1]} : vector<2x128xf32> to vector<2x32xf32>
    %188 = arith.negf %187 : vector<2x32xf32>
    %189 = math.exp %188 : vector<2x32xf32>
    %cst_59 = arith.constant 1.000000e+00 : f32
    %190 = vector.broadcast %cst_59 : f32 to vector<2x32xf32>
    %191 = arith.addf %190, %189 : vector<2x32xf32>
    %192 = arith.divf %190, %191 : vector<2x32xf32>
    %193 = arith.mulf %184, %166 : vector<2x32xf32>
    %194 = arith.mulf %178, %186 : vector<2x32xf32>
    %195 = arith.addf %193, %194 : vector<2x32xf32>
    %196 = math.tanh %195 : vector<2x32xf32>
    %197 = arith.mulf %192, %196 : vector<2x32xf32>
    %c6 = arith.constant 6 : index
    %c0_60 = arith.constant 0 : index
    %c0_61 = arith.constant 0 : index
    %198 = vector.load %arg8[%c6, %c0_60, %c0_61] : memref<8x2x128xf32, #tpu.memory_space<vmem>>, vector<1x2x128xf32>
    %199 = vector.shape_cast %198 : vector<1x2x128xf32> to vector<2x128xf32>
    %cst_62 = arith.constant dense<0.000000e+00> : vector<2x128xf32>
    %200 = tpu.matmul %197, %21, %cst_62 {dimension_numbers = #tpu.dot_dimension_numbers<[1], [0], [0], [1], [0, 0, 1, 1], [], []>} : vector<2x32xf32>, vector<32x128xf32>, vector<2x128xf32> -> vector<2x128xf32>
    %201 = arith.addf %199, %200 : vector<2x128xf32>
    %202 = vector.extract_strided_slice %201 {offsets = [0, 0], sizes = [2, 32], strides = [1, 1]} : vector<2x128xf32> to vector<2x32xf32>
    %203 = arith.negf %202 : vector<2x32xf32>
    %204 = math.exp %203 : vector<2x32xf32>
    %cst_63 = arith.constant 1.000000e+00 : f32
    %205 = vector.broadcast %cst_63 : f32 to vector<2x32xf32>
    %206 = arith.addf %205, %204 : vector<2x32xf32>
    %207 = arith.divf %205, %206 : vector<2x32xf32>
    %208 = vector.extract_strided_slice %201 {offsets = [0, 32], sizes = [2, 32], strides = [1, 1]} : vector<2x128xf32> to vector<2x32xf32>
    %209 = arith.negf %208 : vector<2x32xf32>
    %210 = math.exp %209 : vector<2x32xf32>
    %cst_64 = arith.constant 1.000000e+00 : f32
    %211 = vector.broadcast %cst_64 : f32 to vector<2x32xf32>
    %212 = arith.addf %211, %210 : vector<2x32xf32>
    %213 = arith.divf %211, %212 : vector<2x32xf32>
    %214 = vector.extract_strided_slice %201 {offsets = [0, 64], sizes = [2, 32], strides = [1, 1]} : vector<2x128xf32> to vector<2x32xf32>
    %215 = math.tanh %214 : vector<2x32xf32>
    %216 = vector.extract_strided_slice %201 {offsets = [0, 96], sizes = [2, 32], strides = [1, 1]} : vector<2x128xf32> to vector<2x32xf32>
    %217 = arith.negf %216 : vector<2x32xf32>
    %218 = math.exp %217 : vector<2x32xf32>
    %cst_65 = arith.constant 1.000000e+00 : f32
    %219 = vector.broadcast %cst_65 : f32 to vector<2x32xf32>
    %220 = arith.addf %219, %218 : vector<2x32xf32>
    %221 = arith.divf %219, %220 : vector<2x32xf32>
    %222 = arith.mulf %213, %195 : vector<2x32xf32>
    %223 = arith.mulf %207, %215 : vector<2x32xf32>
    %224 = arith.addf %222, %223 : vector<2x32xf32>
    %225 = math.tanh %224 : vector<2x32xf32>
    %226 = arith.mulf %221, %225 : vector<2x32xf32>
    %c7 = arith.constant 7 : index
    %c0_66 = arith.constant 0 : index
    %c0_67 = arith.constant 0 : index
    %227 = vector.load %arg8[%c7, %c0_66, %c0_67] : memref<8x2x128xf32, #tpu.memory_space<vmem>>, vector<1x2x128xf32>
    %228 = vector.shape_cast %227 : vector<1x2x128xf32> to vector<2x128xf32>
    %cst_68 = arith.constant dense<0.000000e+00> : vector<2x128xf32>
    %229 = tpu.matmul %226, %21, %cst_68 {dimension_numbers = #tpu.dot_dimension_numbers<[1], [0], [0], [1], [0, 0, 1, 1], [], []>} : vector<2x32xf32>, vector<32x128xf32>, vector<2x128xf32> -> vector<2x128xf32>
    %230 = arith.addf %228, %229 : vector<2x128xf32>
    %231 = vector.extract_strided_slice %230 {offsets = [0, 0], sizes = [2, 32], strides = [1, 1]} : vector<2x128xf32> to vector<2x32xf32>
    %232 = arith.negf %231 : vector<2x32xf32>
    %233 = math.exp %232 : vector<2x32xf32>
    %cst_69 = arith.constant 1.000000e+00 : f32
    %234 = vector.broadcast %cst_69 : f32 to vector<2x32xf32>
    %235 = arith.addf %234, %233 : vector<2x32xf32>
    %236 = arith.divf %234, %235 : vector<2x32xf32>
    %237 = vector.extract_strided_slice %230 {offsets = [0, 32], sizes = [2, 32], strides = [1, 1]} : vector<2x128xf32> to vector<2x32xf32>
    %238 = arith.negf %237 : vector<2x32xf32>
    %239 = math.exp %238 : vector<2x32xf32>
    %cst_70 = arith.constant 1.000000e+00 : f32
    %240 = vector.broadcast %cst_70 : f32 to vector<2x32xf32>
    %241 = arith.addf %240, %239 : vector<2x32xf32>
    %242 = arith.divf %240, %241 : vector<2x32xf32>
    %243 = vector.extract_strided_slice %230 {offsets = [0, 64], sizes = [2, 32], strides = [1, 1]} : vector<2x128xf32> to vector<2x32xf32>
    %244 = math.tanh %243 : vector<2x32xf32>
    %245 = vector.extract_strided_slice %230 {offsets = [0, 96], sizes = [2, 32], strides = [1, 1]} : vector<2x128xf32> to vector<2x32xf32>
    %246 = arith.negf %245 : vector<2x32xf32>
    %247 = math.exp %246 : vector<2x32xf32>
    %cst_71 = arith.constant 1.000000e+00 : f32
    %248 = vector.broadcast %cst_71 : f32 to vector<2x32xf32>
    %249 = arith.addf %248, %247 : vector<2x32xf32>
    %250 = arith.divf %248, %249 : vector<2x32xf32>
    %251 = arith.mulf %242, %224 : vector<2x32xf32>
    %252 = arith.mulf %236, %244 : vector<2x32xf32>
    %253 = arith.addf %251, %252 : vector<2x32xf32>
    %254 = math.tanh %253 : vector<2x32xf32>
    %255 = arith.mulf %250, %254 : vector<2x32xf32>
    %c0_72 = arith.constant 0 : index
    %c0_73 = arith.constant 0 : index
    %256 = vector.load %arg9[%c0_72, %c0_73] : memref<2x32xf32, #tpu.memory_space<vmem>>, vector<2x32xf32>
    tpu.vector_store %arg9[%c0_72, %c0_73], %255 {strides = array<i32>} : memref<2x32xf32, #tpu.memory_space<vmem>>, vector<2x32xf32>,
    %c0_74 = arith.constant 0 : index
    %c0_75 = arith.constant 0 : index
    %257 = vector.load %arg10[%c0_74, %c0_75] : memref<2x32xf32, #tpu.memory_space<vmem>>, vector<2x32xf32>
    tpu.vector_store %arg10[%c0_74, %c0_75], %253 {strides = array<i32>} : memref<2x32xf32, #tpu.memory_space<vmem>>, vector<2x32xf32>,
    %c1_i32 = arith.constant 1 : i32
    %258 = arith.cmpi eq, %arg0, %c1_i32 : i32
    %259 = arith.extui %258 : i1 to i32
    %c0_i32_76 = arith.constant 0 : i32
    %260 = arith.cmpi ne, %259, %c0_i32_76 : i32
    scf.if %260 {
      %c0_77 = arith.constant 0 : index
      %c0_78 = arith.constant 0 : index
      %261 = vector.load %arg5[%c0_77, %c0_78] : memref<32x4xf32, #tpu.memory_space<vmem>>, vector<32x4xf32>
      %cst_79 = arith.constant dense<0.000000e+00> : vector<2x4xf32>
      %262 = tpu.matmul %255, %261, %cst_79 {dimension_numbers = #tpu.dot_dimension_numbers<[1], [0], [0], [1], [0, 0, 1, 1], [], []>} : vector<2x32xf32>, vector<32x4xf32>, vector<2x4xf32> -> vector<2x4xf32>
      %c0_80 = arith.constant 0 : index
      %c0_81 = arith.constant 0 : index
      %263 = vector.load %arg6[%c0_80, %c0_81] : memref<1x4xf32, #tpu.memory_space<vmem>>, vector<1x4xf32>
      %264 = vector.broadcast %263 : vector<1x4xf32> to vector<2x4xf32>
      %265 = arith.addf %262, %264 : vector<2x4xf32>
      %cst_82 = arith.constant dense<0xFF800000> : vector<4xf32>
      %266 = vector.multi_reduction <maximumf>, %265, %cst_82 [0] : vector<2x4xf32> to vector<4xf32>
      %267 = vector.shape_cast %266 : vector<4xf32> to vector<1x4xf32>
      %268 = vector.broadcast %267 : vector<1x4xf32> to vector<2x4xf32>
      %269 = arith.subf %265, %268 : vector<2x4xf32>
      %270 = math.exp %269 : vector<2x4xf32>
      %cst_83 = arith.constant dense<0.000000e+00> : vector<4xf32>
      %271 = vector.multi_reduction <add>, %270, %cst_83 [0] : vector<2x4xf32> to vector<4xf32>
      %272 = vector.shape_cast %271 : vector<4xf32> to vector<1x4xf32>
      %273 = tpu.reciprocal %272 : vector<1x4xf32> -> vector<1x4xf32>
      %274 = vector.broadcast %273 : vector<1x4xf32> to vector<2x4xf32>
      %275 = arith.mulf %270, %274 : vector<2x4xf32>
      %c0_84 = arith.constant 0 : index
      %c0_85 = arith.constant 0 : index
      %276 = vector.load %arg7[%c0_84, %c0_85] : memref<2x4xf32, #tpu.memory_space<vmem>>, vector<2x4xf32>
      tpu.vector_store %arg7[%c0_84, %c0_85], %275 {strides = array<i32>} : memref<2x4xf32, #tpu.memory_space<vmem>>, vector<2x4xf32>,
    } else {
    }
    return
  }
  func.func @transform_0(%arg0: i32) -> (i32, i32, i32) {
    %c0_i32 = arith.constant 0 : i32
    %c0_i32_0 = arith.constant 0 : i32
    %c0_i32_1 = arith.constant 0 : i32
    return %c0_i32, %arg0, %c0_i32_0 : i32, i32, i32
  }
  func.func @transform_1(%arg0: i32) -> (i32, i32) {
    %c0_i32 = arith.constant 0 : i32
    %c0_i32_0 = arith.constant 0 : i32
    %c0_i32_1 = arith.constant 0 : i32
    return %c0_i32, %c0_i32_0 : i32, i32
  }
  func.func @transform_2(%arg0: i32) -> (i32, i32) {
    %c0_i32 = arith.constant 0 : i32
    %c0_i32_0 = arith.constant 0 : i32
    %c0_i32_1 = arith.constant 0 : i32
    return %c0_i32, %c0_i32_0 : i32, i32
  }
  func.func @transform_3(%arg0: i32) -> (i32, i32) {
    %c0_i32 = arith.constant 0 : i32
    %c0_i32_0 = arith.constant 0 : i32
    %c0_i32_1 = arith.constant 0 : i32
    return %c0_i32, %c0_i32_0 : i32, i32
  }
  func.func @transform_4(%arg0: i32) -> (i32, i32) {
    %c0_i32 = arith.constant 0 : i32
    %c0_i32_0 = arith.constant 0 : i32
    %c0_i32_1 = arith.constant 0 : i32
    return %c0_i32, %c0_i32_0 : i32, i32
  }
  func.func @transform_5(%arg0: i32) -> (i32, i32) {
    %c0_i32 = arith.constant 0 : i32
    %c0_i32_0 = arith.constant 0 : i32
    %c0_i32_1 = arith.constant 0 : i32
    return %c0_i32, %c0_i32_0 : i32, i32
  }
  func.func @transform_6(%arg0: i32) -> (i32, i32) {
    %c0_i32 = arith.constant 0 : i32
    %c0_i32_0 = arith.constant 0 : i32
    %c0_i32_1 = arith.constant 0 : i32
    return %c0_i32, %c0_i32_0 : i32, i32
  }
}

</mosaic_0001>

<bundles_post_ra>
// kernel: tpu_custom_call.1
= control target key start
LH: loop header
LB: loop body
LE: loop exit
PB: predicated region body
PF: predicated region fallthrough
CT: control target
= control target key end

     0   :  { %11 = vsyncpa [#allocation7], 0  ;;  %s2034_s21 = smov 0   ;;  %s2036_s22 = smov 0   ;;  %s2234_s0 = inlined_call_operand.vmem [shape: f32[2,16,8], index: 0, kind: input, shape index: {}]   ;;  %s2235_s1 = inlined_call_operand.vmem [shape: f32[8,128], index: 1, kind: input, shape index: {}]   ;;  %s2236_s2 = inlined_call_operand.vmem [shape: f32[32,128], index: 2, kind: input, shape index: {}]   ;;  %s2237_s3 = inlined_call_operand.vmem [shape: f32[1,128], index: 3, kind: input, shape index: {}]   ;;  %s2238_s4 = inlined_call_operand.vmem [shape: f32[32,4], index: 4, kind: input, shape index: {}]   ;;  %s2239_s5 = inlined_call_operand.vmem [shape: f32[1,4], index: 5, kind: input, shape index: {}]   ;;  %s2240_s6 = inlined_call_operand.hbm [shape: f32[2,4], index: 6, kind: output, shape index: {}]  }
   0x1   :  { %s2038_s23 = smov 0  }
   0x2 LB: > { %s2047_s24 = sadd.s32 4294967295, %s1985_s23   ;;  %s2049_s25 = sadd.s32 1, %s1985_s23   ;;  %s1985_s23 = sphi %s2038_s23, %s2243_s23   ;;  %s1981_s22 = sphi %s2036_s22, %s2242_s22   ;;  %s1977_s21 = sphi %s2034_s21, %s2241_s21  }
   0x3   : > { %s21_s26 = ssub.s32 %s1985_s23, %s2049_s25  ;;  %s24_s27 = sadd.s32 1, %s1981_s22 }
   0x4   : > { %p22_p0 = scmp.eq.s32.totalorder %s21_s26, 0  ;;  %p31_p1 = scmp.ne.s32.totalorder %s1981_s22, %s1977_s21 }
   0x5   : > { %p32_p2 = scmp.eq.s32.totalorder %s1985_s23, 0  ;;  %p1570_p4 = scmp.ge.s32.totalorder %s1985_s23, 2 }
   0x6   : > { %s2056_s28 = scalar_select %p22_p0, %s1981_s22, %s24_s27  }
   0x7   : > { %p33_p3 = por %p32_p2, %p31_p1  ;;  %198 = sbr.rel (%p1570_p4) target bundleno = 21 (0x15), region = 36 }
   0xe   : > { %201 = sbr.rel (!%p33_p3) target bundleno = 21 (0x15), region = 40  ;;  %s203_s29 = sand.u32 (%p33_p3), 1, %s1981_s22  }
   0xf   : > { %s1572_s30 = sshll.u32 (%p33_p3), %s1985_s23, 3  ;;  %s1571_s7 = sshll.u32 (%p33_p3), %s203_s29, 4 }
  0x10   : > { %s207_s10 = scalar_lea.vmem (%p33_p3), %s2234_s0, %s1572_s30  ;;  %s205_s11 = scalar_lea.vmem (%p33_p3), [#allocation5], %s1571_s7 }
  0x11   : > { %v237_v0 = vld [vmem:[%s207_s10] sm:$0xff] (%p33_p3)  ;;  %v239_v1 = vld [vmem:[%s207_s10 + $0x10] sm:$0xff] (%p33_p3) }
  0x12   : > { %238 = vst [vmem:[%s205_s11] sm:$0xff] (%p33_p3), %v237_v0  ;;  %240 = vst [vmem:[%s205_s11 + $0x8] sm:$0xff] (%p33_p3), %v239_v1 }
  0x15 PF: > { %p1573_p5 = scmp.ge.s32.totalorder %s1985_s23, 1  ;;  %p245_p6 = scmp.lt.s32.totalorder %s1985_s23, 3 }
  0x17   : > { %p246_p7 = pnand %p1573_p5, %p245_p6 }
  0x18   : > { %s252_s12 = sand.u32 (!%p246_p7), 1, %s1977_s21   ;;  %p1575_p8 = scmp.ne.s32.totalorder (!%p246_p7), %s2047_s24, 0 }
  0x19   : > { %249 = sbr.rel (%p246_p7) target bundleno = 5966 (0x174e), region = 78  ;;  %s1574_s13 = sshll.u32 (!%p246_p7), %s252_s12, 4 }
  0x1a   : > { %s254_s14 = scalar_lea.vmem (!%p246_p7), [#allocation5], %s1574_s13 }
  0x20   : > { %279 = sbr.rel (%p1575_p8) target bundleno = 39 (0x27), region = 86  ;;  %vm280_vm0 = vcmask (!%p1575_p8), 254976   ;;  %v1987_v2 = vmov (!%p1575_p8), 0.0  }
  0x21   : > { %281 = vst.msk [vmem:[#allocation3] sm:$0x3] (!%p1575_p8), %vm280_vm0, %v1987_v2  ;;  %282 = vst.msk [vmem:[#allocation4] sm:$0x3] (!%p1575_p8), %vm280_vm0, %v1987_v2 }
  0x27 PF: > { %v283_v3 = vld [vmem:[%s2235_s1] sm:$0xff]  ;;  %v1988_v5 = vmov 0.0   ;;  %vm292_vm1 = vcmask 64512   ;;  %v574_v8 = vld [vmem:[%s2236_s2 + $0x8] sm:$0xff]  ;;  %vm1989_vm2 = vmmov 0   ;;  %v575_v10 = vld [vmem:[%s2236_s2 + $0x10] sm:$0xff]  ;;  %v371_v17 = vlaneseq }
  0x28   : > { %v285_v4 = vld [vmem:[%s254_s14] sm:$0xff]  ;;  %1660 = vmatprep.subr.mxu0 %v1988_v5  ;;  %1665 = vmatprep.subr.mxu1 %v1988_v5  ;;  %v1582_v6 = vld [vmem:[%s254_s14 + $0x8] sm:$0xff]  ;;  %v1990_v12 = vmov 0.0|0.0   ;;  %vm580_vm3 = vcmask 261120   ;;  %v1991_v15 = vmov 1966171168  }
  0x29   : > { %v573_v7 = vld [vmem:[%s2236_s2] sm:$0xff]  ;;  %1661 = vmatpush3.msra.mxu0 %v283_v3  ;;  %1662 = vmatprep.mubr.msk.f32.mxu0 %vm1989_vm2, %v1988_v5  ;;  %v576_v11 = vld [vmem:[%s2236_s2 + $0x18] sm:$0xff]  ;;  %v577_v14 = vld [vmem:[#allocation3] sm:$0x3]  ;;  %v369_v16 = vunpack.c.l.s4 %v1991_v15  ;;  %v372_v19 = vshrl.u32 %v371_v17, 7  ;;  %s1992_s7 = smov 64  }
  0x2a   : > { %v2077_v9 = vpack.c.bf16 %v574_v8, %v573_v7  ;;  %1666 = vmatpush3.msra.mxu1 %v283_v3  ;;  %1667 = vmatprep.mubr.msk.f32.mxu1 %vm1989_vm2, %v1988_v5  ;;  %v2091_v13 = vpack.c.bf16 %v576_v11, %v575_v10  ;;  %v1576_v20 = vld [vmem:[%s2237_s3] ss:$0 sm:$0xff]  ;;  %v578_v59 = vld [vmem:[#allocation4] sm:$0x3]  ;;  %s1993_s8 = smov 32   ;;  %s1994_s9 = smov 96  }
  0x2b   : > { %1663 = vmatmul.mubr.msk.f32.vlgmr.msra.gmra.mrb[0].mxu0 %vm292_vm1, %v285_v4  ;;  %1668 = vmatmul.mubr.msk.f32.vlgmr.msra.gmra.mrb[0].mxu1 %vm292_vm1, %v1582_v6  ;;  %v370_v18 = vunpack.c.0.s8 %v369_v16  ;;  %vm1401_vm4 = vcmask 254976   ;;  %p1604_p9 = scmp.ne.s32.totalorder %s2047_s24, 1 }
  0x2c   : > { %1769 = vmatprep.subr.bf16.mxu0 %v1990_v12  ;;  %1678 = vmatprep.mubr.msk.f32.mxu0 %vm1989_vm2, %v1988_v5  ;;  %vm1996_vm5 = vmmov (!%p1604_p9), 0   ;;  %vm1495_vm6 = vcmask (!%p1604_p9), 25600  }
  0x2d   : > { %1771 = vmatpush3.bf16.msra.mxu0 %v2077_v9  ;;  %1775 = vmatprep.subr.bf16.mxu1 %v1990_v12  ;;  %v373_v21 = vsub.s32 %v370_v18, %v372_v19 }
  0x2e   : > { %1772 = vmatprep.subr.bf16.mxu0 %v1990_v12  ;;  %1777 = vmatpush3.bf16.msra.mxu1 %v2077_v9 }
  0x2f   : > { %1778 = vmatprep.subr.bf16.mxu1 %v1990_v12  ;;  %1689 = vmatprep.mubr.msk.f32.mxu1 %vm1989_vm2, %v1988_v5 }
  0x31   : > { %1774 = vmatpush3.bf16.msra.mxu0 %v2091_v13 }
  0x32   : > { %1780 = vmatpush3.bf16.msra.mxu1 %v2091_v13  ;;  %1781 = vmatprep.subr.bf16.mxu0 %v1990_v12 }
  0x33   : > { %1787 = vmatprep.subr.bf16.mxu1 %v1990_v12 }
  0x34   : > { %1679 = vmatmul.mubr.msk.f32.vlgmr.msra.gmra.mrb[2].mxu0 %vm580_vm3, %v577_v14 }
  0x35   : > { %1783 = vmatpush3.bf16.msra.mxu0 %v2077_v9  ;;  %1700 = vmatprep.mubr.msk.f32.mxu0 %vm1989_vm2, %v1988_v5 }
  0x36   : > { %1784 = vmatprep.subr.bf16.mxu0 %v1990_v12 }
  0x39   : > { %1786 = vmatpush3.bf16.msra.mxu0 %v2091_v13 }
  0x3a   : > { %1793 = vmatprep.subr.bf16.mxu0 %v1990_v12 }
  0xfe   : > { %v362_v22 = vpop.f32.mrb[0].mxu0  ;;  %v503_v23 = vpop.f32.mrb[0].mxu1 }
  0xff   : > { %v363_v24 = vadd.f32 %v1576_v20, %v362_v22  ;;  %v504_v25 = vadd.f32 %v1576_v20, %v503_v23  ;;  %v1664_v26 = vpop.f32.mrb[1].mxu0  ;;  %v1669_v27 = vpop.f32.mrb[1].mxu1 }
 0x101   : > { %v367_v28 = vcombine.high %v363_v24, %v363_v24  ;;  %v374_v29 = vrot.slane %v363_v24, %v373_v21  ;;  %v508_v30 = vcombine.high %v504_v25, %v504_v25  ;;  %v515_v31 = vrot.slane %v504_v25, %v373_v21 }
 0x103   : > { %v381_v32 = vrot.slane %v367_v28, %v373_v21  ;;  %v382_v33 = vcombine.high %v374_v29, %v374_v29  ;;  %v390_v34 = vrot.slane %v374_v29, %v373_v21  ;;  %1578 = vst.sshfl [vmem:[#allocation2] sm:$0x1 pattern:$0x73625140] %v374_v29  ;;  %v522_v35 = vrot.slane %v508_v30, %v373_v21 }
 0x104   : > { %1584 = vst.sshfl [vmem:[#allocation2 + $0x1] sm:$0x1 pattern:$0x73625140] %v515_v31  ;;  %v523_v36 = vcombine.high %v515_v31, %v515_v31  ;;  %v531_v37 = vrot.slane %v515_v31, %v373_v21 }
 0x105   : > { %v383_v38 = vcombine.high %v381_v32, %v381_v32  ;;  %v397_v39 = vrot.slane %v381_v32, %v373_v21  ;;  %v404_v40 = vrot.slane %v382_v33, %v373_v21  ;;  %v412_v41 = vcombine.high %v390_v34, %v390_v34  ;;  %1579 = vst.sshfl [vmem:[#allocation2 + $0x2] sm:$0x1 pattern:$0x73625140] %v382_v33 }
 0x106   : > { %1580 = vst.sshfl [vmem:[#allocation2 + $0x8] sm:$0x1 pattern:$0x73625140] %v381_v32  ;;  %v524_v42 = vcombine.high %v522_v35, %v522_v35  ;;  %v538_v43 = vrot.slane %v522_v35, %v373_v21  ;;  %v545_v44 = vrot.slane %v523_v36, %v373_v21  ;;  %v553_v45 = vcombine.high %v531_v37, %v531_v37 }
 0x107   : > { %1586 = vst.sshfl [vmem:[#allocation2 + $0x9] sm:$0x1 pattern:$0x73625140] %v522_v35  ;;  %v411_v46 = vrot.slane %v383_v38, %v373_v21  ;;  %v413_v47 = vcombine.high %v397_v39, %v397_v39  ;;  %v414_v48 = vcombine.high %v404_v40, %v404_v40  ;;  %426 = vst [vmem:[#allocation2 + $0x4] sm:$0x1] %v412_v41 }
 0x108   : > { %1585 = vst.sshfl [vmem:[#allocation2 + $0x3] sm:$0x1 pattern:$0x73625140] %v523_v36  ;;  %v650_v49 = vpop.f32.mrb[2].mxu0  ;;  %v552_v50 = vrot.slane %v524_v42, %v373_v21  ;;  %v554_v51 = vcombine.high %v538_v43, %v538_v43  ;;  %v555_v52 = vcombine.high %v545_v44, %v545_v44 }
 0x109   : > { %1581 = vst.sshfl [vmem:[#allocation2 + $0xa] sm:$0x1 pattern:$0x73625140] %v383_v38  ;;  %567 = vst [vmem:[#allocation2 + $0x5] sm:$0x1] %v553_v45  ;;  %v415_v54 = vcombine.high %v411_v46, %v411_v46 }
 0x10a   : > { %1587 = vst.sshfl [vmem:[#allocation2 + $0xb] sm:$0x1 pattern:$0x73625140] %v524_v42  ;;  %v1680_v53 = vpop.f32.mrb[3].mxu0  ;;  %v556_v55 = vcombine.high %v552_v50, %v552_v50 }
 0x10b   : > { %427 = vst [vmem:[#allocation2 + $0x6] sm:$0x1] %v414_v48  ;;  %430 = vst [vmem:[#allocation2 + $0xc] sm:$0x1] %v413_v47  ;;  %v579_v56 = vld [vmem:[#allocation2] sm:$0x3] }
 0x10c   : > { %568 = vst [vmem:[#allocation2 + $0x7] sm:$0x1] %v555_v52  ;;  %571 = vst [vmem:[#allocation2 + $0xd] sm:$0x1] %v554_v51  ;;  %v654_v57 = vadd.f32 %v650_v49, %v579_v56 }
 0x10d   : > { %431 = vst [vmem:[#allocation2 + $0xe] sm:$0x1] %v415_v54  ;;  %572 = vst [vmem:[#allocation2 + $0xf] sm:$0x1] %v556_v55 }
 0x10e   : > { %1865 = vtanh.f32 %v654_v57  ;;  %v1589_v60 = vmul.f32 -1.442695, %v654_v57 }
 0x10f   : > { %v684_v14 = vld [vmem:[#allocation2 + $0x2] sm:$0x3] }
 0x110   : > { %1867 = vpow2.f32 %v1589_v60  ;;  %v786_v32 = vld [vmem:[#allocation2 + $0x4] sm:$0x3] }
 0x113   : > { %v888_v50 = vld [vmem:[#allocation2 + $0x6] sm:$0x3] }
 0x118   : > { %v1866_v58 = vpop.eup %1865 }
 0x119   : > { %668 = vrot.lane.b32.xlu0 %v1866_v58, %s1992_s7 }
 0x11a   : > { %v1868_v61 = vpop.eup %1867 }
 0x11b   : > { %v658_v62 = vadd.f32 1.0, %v1868_v61 }
 0x11d   : > { %663 = vrot.lane.b32.xlu0 %v578_v59, %s1993_s8  ;;  %1869 = vrcp.f32 %v658_v62 }
 0x127   : > { %v1870_v63 = vpop.eup %1869 }
 0x18b   : > { %v669_v0 = vpop.permute.xlu0 %668 }
 0x18c   : > { %v671_v1 = vmul.f32 %v1870_v63, %v669_v0 }
 0x18e   : > { %673 = vrot.lane.b32.xlu1 %v671_v1, %s1993_s8 }
 0x18f   : > { %v664_v2 = vpop.permute.xlu0 %663 }
 0x190   : > { %v666_v3 = vmul.f32 %v1870_v63, %v664_v2 }
 0x200   : > { %v674_v4 = vpop.permute.xlu1 %673 }
 0x201   : > { %v676_v6 = vadd.f32 %v674_v4, %v666_v3  ;;  %v990_v4 = vld [vmem:[#allocation2 + $0x8] sm:$0x3] }
 0x203   : > { %1871 = vtanh.f32 %v676_v6 }
 0x20d   : > { %v1872_v7 = vpop.eup %1871 }
 0x20e   : > { %679 = vrot.lane.b32.xlu1 %v1872_v7, %s1992_s7 }
 0x280   : > { %v680_v8 = vpop.permute.xlu1 %679 }
 0x281   : > { %v682_v10 = vmul.f32 %v1870_v63, %v680_v8 }
 0x283   : > { %686 = vrot.lane.b32.xlu0 %v682_v10, %s1993_s8 }
 0x2f5   : > { %v687_v11 = vpop.permute.xlu0 %686 }
 0x2f6   : > { %1690 = vmatmul.mubr.msk.f32.vlgmr.msra.gmra.mrb[2].mxu1 %vm580_vm3, %v687_v11 }
 0x2f7   : > { %1789 = vmatpush3.bf16.msra.mxu1 %v2077_v9  ;;  %1711 = vmatprep.mubr.msk.f32.mxu1 %vm1989_vm2, %v1988_v5 }
 0x2f8   : > { %1790 = vmatprep.subr.bf16.mxu1 %v1990_v12 }
 0x2fb   : > { %1792 = vmatpush3.bf16.msra.mxu1 %v2091_v13 }
 0x2fc   : > { %1799 = vmatprep.subr.bf16.mxu1 %v1990_v12 }
 0x3c9   : > { %v756_v15 = vpop.f32.mrb[2].mxu1 }
 0x3ca   : > { %v760_v16 = vadd.f32 %v756_v15, %v684_v14  ;;  %v1691_v17 = vpop.f32.mrb[3].mxu1 }
 0x3cc   : > { %1873 = vtanh.f32 %v760_v16  ;;  %v1591_v19 = vmul.f32 -1.442695, %v760_v16 }
 0x3ce   : > { %1875 = vpow2.f32 %v1591_v19 }
 0x3d6   : > { %v1874_v18 = vpop.eup %1873 }
 0x3d7   : > { %770 = vrot.lane.b32.xlu1 %v1874_v18, %s1992_s7 }
 0x3d8   : > { %v1876_v20 = vpop.eup %1875 }
 0x3d9   : > { %v764_v21 = vadd.f32 1.0, %v1876_v20 }
 0x3db   : > { %1877 = vrcp.f32 %v764_v21 }
 0x3e5   : > { %v1878_v22 = vpop.eup %1877 }
 0x3e6   : > { %v768_v25 = vmul.f32 %v1878_v22, %v676_v6 }
 0x449   : > { %v771_v23 = vpop.permute.xlu1 %770 }
 0x44a   : > { %v773_v24 = vmul.f32 %v1878_v22, %v771_v23 }
 0x44c   : > { %775 = vrot.lane.b32.xlu0 %v773_v24, %s1993_s8 }
 0x4be   : > { %v776_v26 = vpop.permute.xlu0 %775 }
 0x4bf   : > { %v778_v27 = vadd.f32 %v776_v26, %v768_v25  ;;  %v1092_v26 = vld [vmem:[#allocation2 + $0xa] sm:$0x3] }
 0x4c1   : > { %1879 = vtanh.f32 %v778_v27 }
 0x4cb   : > { %v1880_v28 = vpop.eup %1879 }
 0x4cc   : > { %781 = vrot.lane.b32.xlu1 %v1880_v28, %s1992_s7 }
 0x53e   : > { %v782_v29 = vpop.permute.xlu1 %781 }
 0x53f   : > { %v784_v30 = vmul.f32 %v1878_v22, %v782_v29 }
 0x541   : > { %788 = vrot.lane.b32.xlu0 %v784_v30, %s1993_s8 }
 0x5b3   : > { %v789_v31 = vpop.permute.xlu0 %788 }
 0x5b4   : > { %1701 = vmatmul.mubr.msk.f32.vlgmr.msra.gmra.mrb[4].mxu0 %vm580_vm3, %v789_v31 }
 0x5b5   : > { %1795 = vmatpush3.bf16.msra.mxu0 %v2077_v9  ;;  %1722 = vmatprep.mubr.msk.f32.mxu0 %vm1989_vm2, %v1988_v5 }
 0x5b6   : > { %1796 = vmatprep.subr.bf16.mxu0 %v1990_v12 }
 0x5b9   : > { %1798 = vmatpush3.bf16.msra.mxu0 %v2091_v13 }
 0x5ba   : > { %1805 = vmatprep.subr.bf16.mxu0 %v1990_v12 }
 0x687   : > { %v858_v33 = vpop.f32.mrb[4].mxu0 }
 0x688   : > { %v862_v34 = vadd.f32 %v858_v33, %v786_v32  ;;  %v1702_v35 = vpop.f32.mrb[5].mxu0 }
 0x68a   : > { %1881 = vtanh.f32 %v862_v34  ;;  %v1593_v37 = vmul.f32 -1.442695, %v862_v34 }
 0x68c   : > { %1883 = vpow2.f32 %v1593_v37 }
 0x694   : > { %v1882_v36 = vpop.eup %1881 }
 0x695   : > { %872 = vrot.lane.b32.xlu1 %v1882_v36, %s1992_s7 }
 0x696   : > { %v1884_v38 = vpop.eup %1883 }
 0x697   : > { %v866_v39 = vadd.f32 1.0, %v1884_v38 }
 0x699   : > { %1885 = vrcp.f32 %v866_v39 }
 0x6a3   : > { %v1886_v40 = vpop.eup %1885 }
 0x6a4   : > { %v870_v43 = vmul.f32 %v1886_v40, %v778_v27 }
 0x707   : > { %v873_v41 = vpop.permute.xlu1 %872 }
 0x708   : > { %v875_v42 = vmul.f32 %v1886_v40, %v873_v41 }
 0x70a   : > { %877 = vrot.lane.b32.xlu0 %v875_v42, %s1993_s8 }
 0x77c   : > { %v878_v44 = vpop.permute.xlu0 %877 }
 0x77d   : > { %v880_v45 = vadd.f32 %v878_v44, %v870_v43 }
 0x77f   : > { %1887 = vtanh.f32 %v880_v45 }
 0x789   : > { %v1888_v46 = vpop.eup %1887 }
 0x78a   : > { %883 = vrot.lane.b32.xlu1 %v1888_v46, %s1992_s7 }
 0x7fc   : > { %v884_v47 = vpop.permute.xlu1 %883 }
 0x7fd   : > { %v886_v48 = vmul.f32 %v1886_v40, %v884_v47  ;;  %v1194_v40 = vld [vmem:[#allocation2 + $0xc] sm:$0x3] }
 0x7ff   : > { %890 = vrot.lane.b32.xlu0 %v886_v48, %s1993_s8 }
 0x871   : > { %v891_v49 = vpop.permute.xlu0 %890 }
 0x872   : > { %1712 = vmatmul.mubr.msk.f32.vlgmr.msra.gmra.mrb[4].mxu1 %vm580_vm3, %v891_v49 }
 0x873   : > { %1801 = vmatpush3.bf16.msra.mxu1 %v2077_v9  ;;  %1733 = vmatprep.mubr.msk.f32.mxu1 %vm1989_vm2, %v1988_v5 }
 0x874   : > { %1802 = vmatprep.subr.bf16.mxu1 %v1990_v12 }
 0x877   : > { %1804 = vmatpush3.bf16.msra.mxu1 %v2091_v13 }
 0x878   : > { %1811 = vmatprep.subr.bf16.mxu1 %v1990_v12 }
 0x945   : > { %v960_v51 = vpop.f32.mrb[4].mxu1 }
 0x946   : > { %v964_v52 = vadd.f32 %v960_v51, %v888_v50  ;;  %v1713_v53 = vpop.f32.mrb[5].mxu1 }
 0x948   : > { %1889 = vtanh.f32 %v964_v52  ;;  %v1595_v55 = vmul.f32 -1.442695, %v964_v52 }
 0x94a   : > { %1891 = vpow2.f32 %v1595_v55 }
 0x952   : > { %v1890_v54 = vpop.eup %1889 }
 0x953   : > { %974 = vrot.lane.b32.xlu1 %v1890_v54, %s1992_s7 }
 0x954   : > { %v1892_v56 = vpop.eup %1891 }
 0x955   : > { %v968_v57 = vadd.f32 1.0, %v1892_v56 }
 0x957   : > { %1893 = vrcp.f32 %v968_v57 }
 0x961   : > { %v1894_v58 = vpop.eup %1893 }
 0x962   : > { %v972_v61 = vmul.f32 %v1894_v58, %v880_v45 }
 0x9c5   : > { %v975_v59 = vpop.permute.xlu1 %974 }
 0x9c6   : > { %v977_v60 = vmul.f32 %v1894_v58, %v975_v59 }
 0x9c8   : > { %979 = vrot.lane.b32.xlu0 %v977_v60, %s1993_s8 }
 0xa3a   : > { %v980_v62 = vpop.permute.xlu0 %979 }
 0xa3b   : > { %v982_v63 = vadd.f32 %v980_v62, %v972_v61 }
 0xa3d   : > { %1895 = vtanh.f32 %v982_v63 }
 0xa47   : > { %v1896_v0 = vpop.eup %1895 }
 0xa48   : > { %985 = vrot.lane.b32.xlu1 %v1896_v0, %s1992_s7 }
 0xaba   : > { %v986_v1 = vpop.permute.xlu1 %985 }
 0xabb   : > { %v988_v2 = vmul.f32 %v1894_v58, %v986_v1  ;;  %v1296_v58 = vld [vmem:[#allocation2 + $0xe] sm:$0x3] }
 0xabd   : > { %992 = vrot.lane.b32.xlu0 %v988_v2, %s1993_s8 }
 0xb2f   : > { %v993_v3 = vpop.permute.xlu0 %992 }
 0xb30   : > { %1723 = vmatmul.mubr.msk.f32.vlgmr.msra.gmra.mrb[6].mxu0 %vm580_vm3, %v993_v3 }
 0xb31   : > { %1807 = vmatpush3.bf16.msra.mxu0 %v2077_v9  ;;  %1744 = vmatprep.mubr.msk.f32.mxu0 %vm1989_vm2, %v1988_v5 }
 0xb32   : > { %1808 = vmatprep.subr.bf16.mxu0 %v1990_v12 }
 0xb35   : > { %1810 = vmatpush3.bf16.msra.mxu0 %v2091_v13 }
 0xc03   : > { %v1062_v6 = vpop.f32.mrb[6].mxu0 }
 0xc04   : > { %v1066_v7 = vadd.f32 %v1062_v6, %v990_v4  ;;  %v1724_v8 = vpop.f32.mrb[7].mxu0 }
 0xc06   : > { %1897 = vtanh.f32 %v1066_v7  ;;  %v1597_v11 = vmul.f32 -1.442695, %v1066_v7 }
 0xc08   : > { %1899 = vpow2.f32 %v1597_v11 }
 0xc10   : > { %v1898_v10 = vpop.eup %1897 }
 0xc11   : > { %1076 = vrot.lane.b32.xlu1 %v1898_v10, %s1992_s7 }
 0xc12   : > { %v1900_v14 = vpop.eup %1899 }
 0xc13   : > { %v1070_v15 = vadd.f32 1.0, %v1900_v14 }
 0xc15   : > { %1901 = vrcp.f32 %v1070_v15 }
 0xc1f   : > { %v1902_v16 = vpop.eup %1901 }
 0xc20   : > { %v1074_v19 = vmul.f32 %v1902_v16, %v982_v63 }
 0xc83   : > { %v1077_v17 = vpop.permute.xlu1 %1076 }
 0xc84   : > { %v1079_v18 = vmul.f32 %v1902_v16, %v1077_v17  ;;  %v1412_v17 = vld [vmem:[%s2238_s4] sm:$0xff] (!%p1604_p9) }
 0xc86   : > { %1081 = vrot.lane.b32.xlu0 %v1079_v18, %s1993_s8  ;;  %v1413_v18 = vld [vmem:[%s2238_s4 + $0x8] sm:$0xff] (!%p1604_p9) }
 0xcf8   : > { %v1082_v20 = vpop.permute.xlu0 %1081 }
 0xcf9   : > { %v1084_v21 = vadd.f32 %v1082_v20, %v1074_v19  ;;  %v1414_v19 = vld [vmem:[%s2238_s4 + $0x10] sm:$0xff] (!%p1604_p9)  ;;  %v1995_v20 = vmov (!%p1604_p9), 0.0|0.0  }
 0xcfa   : > { %1817 = vmatprep.subr.bf16.mxu0 (!%p1604_p9), %v1995_v20 }
 0xcfb   : > { %1903 = vtanh.f32 %v1084_v21 }
 0xd05   : > { %v1904_v22 = vpop.eup %1903 }
 0xd06   : > { %1087 = vrot.lane.b32.xlu1 %v1904_v22, %s1992_s7  ;;  %v1415_v22 = vld [vmem:[%s2238_s4 + $0x18] sm:$0xff] (!%p1604_p9) }
 0xd78   : > { %v1088_v23 = vpop.permute.xlu1 %1087 }
 0xd79   : > { %v1090_v24 = vmul.f32 %v1902_v16, %v1088_v23  ;;  %v1997_v23 = vmov (!%p1604_p9), 0.0  }
 0xd7b   : > { %1094 = vrot.lane.b32.xlu0 %v1090_v24, %s1993_s8  ;;  %v1821_v24 = vpack.c.bf16 (!%p1604_p9), %v1415_v22, %v1414_v19 }
 0xded   : > { %v1095_v25 = vpop.permute.xlu0 %1094 }
 0xdee   : > { %1734 = vmatmul.mubr.msk.f32.vlgmr.msra.gmra.mrb[6].mxu1 %vm580_vm3, %v1095_v25  ;;  %v1605_v25 = vld [vmem:[%s2239_s5] ss:$0 sm:$0xff] (!%p1604_p9) }
 0xdef   : > { %1813 = vmatpush3.bf16.msra.mxu1 %v2077_v9  ;;  %1755 = vmatprep.mubr.msk.f32.mxu1 %vm1989_vm2, %v1988_v5 }
 0xdf0   : > { %1814 = vmatprep.subr.bf16.mxu1 %v1990_v12 }
 0xdf3   : > { %1816 = vmatpush3.bf16.msra.mxu1 %v2091_v13 }
 0xec1   : > { %v1164_v27 = vpop.f32.mrb[6].mxu1 }
 0xec2   : > { %v1168_v28 = vadd.f32 %v1164_v27, %v1092_v26  ;;  %v1735_v29 = vpop.f32.mrb[7].mxu1 }
 0xec4   : > { %1905 = vtanh.f32 %v1168_v28  ;;  %v1599_v31 = vmul.f32 -1.442695, %v1168_v28 }
 0xec6   : > { %1907 = vpow2.f32 %v1599_v31 }
 0xece   : > { %v1906_v30 = vpop.eup %1905 }
 0xecf   : > { %1178 = vrot.lane.b32.xlu1 %v1906_v30, %s1992_s7 }
 0xed0   : > { %v1908_v32 = vpop.eup %1907 }
 0xed1   : > { %v1172_v33 = vadd.f32 1.0, %v1908_v32 }
 0xed3   : > { %1909 = vrcp.f32 %v1172_v33 }
 0xedd   : > { %v1910_v9 = vpop.eup %1909 }
 0xede   : > { %v1176_v12 = vmul.f32 %v1910_v9, %v1084_v21  ;;  %v1818_v21 = vpack.c.bf16 (!%p1604_p9), %v1413_v18, %v1412_v17 }
 0xf41   : > { %v1179_v34 = vpop.permute.xlu1 %1178 }
 0xf42   : > { %v1181_v5 = vmul.f32 %v1910_v9, %v1179_v34 }
 0xf44   : > { %1183 = vrot.lane.b32.xlu0 %v1181_v5, %s1993_s8 }
 0xfb6   : > { %v1184_v13 = vpop.permute.xlu0 %1183 }
 0xfb7   : > { %v1186_v35 = vadd.f32 %v1184_v13, %v1176_v12 }
 0xfb9   : > { %1911 = vtanh.f32 %v1186_v35 }
 0xfc3   : > { %v1912_v36 = vpop.eup %1911 }
 0xfc4   : > { %1189 = vrot.lane.b32.xlu1 %v1912_v36, %s1992_s7 }
0x1036   : > { %v1190_v37 = vpop.permute.xlu1 %1189 }
0x1037   : > { %v1192_v38 = vmul.f32 %v1910_v9, %v1190_v37 }
0x1039   : > { %1196 = vrot.lane.b32.xlu0 %v1192_v38, %s1993_s8 }
0x10ab   : > { %v1197_v39 = vpop.permute.xlu0 %1196 }
0x10ac   : > { %1745 = vmatmul.mubr.msk.f32.vlgmr.msra.gmra.mrb[8].mxu0 %vm580_vm3, %v1197_v39 }
0x10ad   : > { %1766 = vmatprep.mubr.msk.f32.mxu0 (!%p1604_p9), %vm1996_vm5, %v1997_v23  ;;  %1819 = vmatpush3.bf16.msra.mxu0 (!%p1604_p9), %v1818_v21 }
0x10ae   : > { %1820 = vmatprep.subr.bf16.mxu0 (!%p1604_p9), %v1995_v20 }
0x10b1   : > { %1822 = vmatpush3.bf16.msra.mxu0 (!%p1604_p9), %v1821_v24 }
0x117f   : > { %v1266_v41 = vpop.f32.mrb[8].mxu0 }
0x1180   : > { %v1270_v42 = vadd.f32 %v1266_v41, %v1194_v40  ;;  %v1746_v43 = vpop.f32.mrb[9].mxu0 }
0x1182   : > { %1913 = vtanh.f32 %v1270_v42  ;;  %v1601_v45 = vmul.f32 -1.442695, %v1270_v42 }
0x1184   : > { %1915 = vpow2.f32 %v1601_v45 }
0x118c   : > { %v1914_v44 = vpop.eup %1913 }
0x118d   : > { %1280 = vrot.lane.b32.xlu1 %v1914_v44, %s1992_s7 }
0x118e   : > { %v1916_v46 = vpop.eup %1915 }
0x118f   : > { %v1274_v47 = vadd.f32 1.0, %v1916_v46 }
0x1191   : > { %1917 = vrcp.f32 %v1274_v47 }
0x119b   : > { %v1918_v48 = vpop.eup %1917 }
0x119c   : > { %v1278_v51 = vmul.f32 %v1918_v48, %v1186_v35 }
0x11ff   : > { %v1281_v49 = vpop.permute.xlu1 %1280 }
0x1200   : > { %v1283_v50 = vmul.f32 %v1918_v48, %v1281_v49 }
0x1202   : > { %1285 = vrot.lane.b32.xlu0 %v1283_v50, %s1993_s8 }
0x1274   : > { %v1286_v52 = vpop.permute.xlu0 %1285 }
0x1275   : > { %v1288_v53 = vadd.f32 %v1286_v52, %v1278_v51 }
0x1277   : > { %1919 = vtanh.f32 %v1288_v53 }
0x1281   : > { %v1920_v54 = vpop.eup %1919 }
0x1282   : > { %1291 = vrot.lane.b32.xlu1 %v1920_v54, %s1992_s7 }
0x12f4   : > { %v1292_v55 = vpop.permute.xlu1 %1291 }
0x12f5   : > { %v1294_v56 = vmul.f32 %v1918_v48, %v1292_v55 }
0x12f7   : > { %1298 = vrot.lane.b32.xlu0 %v1294_v56, %s1993_s8 }
0x1369   : > { %v1299_v57 = vpop.permute.xlu0 %1298 }
0x136a   : > { %1756 = vmatmul.mubr.msk.f32.vlgmr.msra.gmra.mrb[8].mxu1 %vm580_vm3, %v1299_v57 }
0x143d   : > { %v1368_v59 = vpop.f32.mrb[8].mxu1 }
0x143e   : > { %v1372_v60 = vadd.f32 %v1368_v59, %v1296_v58  ;;  %v1757_v61 = vpop.f32.mrb[9].mxu1 }
0x1440   : > { %1921 = vtanh.f32 %v1372_v60  ;;  %v1603_v63 = vmul.f32 -1.442695, %v1372_v60 }
0x1442   : > { %1923 = vpow2.f32 %v1603_v63 }
0x144a   : > { %v1922_v62 = vpop.eup %1921 }
0x144b   : > { %1382 = vrot.lane.b32.xlu1 %v1922_v62, %s1992_s7 }
0x144c   : > { %v1924_v0 = vpop.eup %1923 }
0x144d   : > { %v1376_v1 = vadd.f32 1.0, %v1924_v0 }
0x144f   : > { %1925 = vrcp.f32 %v1376_v1 }
0x1459   : > { %v1926_v2 = vpop.eup %1925 }
0x145a   : > { %v1380_v6 = vmul.f32 %v1926_v2, %v1288_v53 }
0x14bd   : > { %v1383_v3 = vpop.permute.xlu1 %1382 }
0x14be   : > { %v1385_v4 = vmul.f32 %v1926_v2, %v1383_v3 }
0x14c0   : > { %1387 = vrot.lane.b32.xlu0 %v1385_v4, %s1993_s8 }
0x1532   : > { %v1388_v7 = vpop.permute.xlu0 %1387 }
0x1533   : > { %v1390_v8 = vadd.f32 %v1388_v7, %v1380_v6 }
0x1535   : > { %1927 = vtanh.f32 %v1390_v8 }
0x153f   : > { %v1928_v10 = vpop.eup %1927 }
0x1540   : > { %1393 = vrot.lane.b32.xlu1 %v1928_v10, %s1992_s7 }
0x1544   : > { %1404 = vrot.lane.b32.xlu1 %v1390_v8, %s1994_s9 }
0x15b2   : > { %v1394_v11 = vpop.permute.xlu1 %1393 }
0x15b3   : > { %v1396_v14 = vmul.f32 %v1926_v2, %v1394_v11 }
0x15b5   : > { %1398 = vrot.lane.b32.xlu0 %v1396_v14, %s1993_s8 }
0x15b6   : > { %v1405_v15 = vpop.permute.xlu1 %1404 }
0x15b7   : > { %1407 = vst.msk [vmem:[#allocation4] sm:$0x3] %vm1401_vm4, %v1405_v15 }
0x1622   : > { %1411 = sbr.rel (%p1604_p9) target bundleno = 5941 (0x1735), region = 90 }
0x1627   : > { %v1399_v16 = vpop.permute.xlu0 %1398 }
0x1628   : > { %1402 = vst.msk [vmem:[#allocation3] sm:$0x3] %vm1401_vm4, %v1399_v16  ;;  %1767 = vmatmul.mubr.msk.f32.vlgmr.msra.gmra.mrb[0].mxu0 (!%p1604_p9), %vm580_vm3, %v1399_v16 }
0x16fb   : > { %v1491_v26 = vpop.f32.mrb[0].mxu0 }
0x16fc   : > { %v1492_v27 = vadd.f32 %v1605_v25, %v1491_v26  ;;  %v1768_v28 = vpop.f32.mrb[1].mxu0 }
0x16fe   : > { %v1496_v29 = vsel %vm1495_vm6, %v1492_v27, -inf }
0x16ff   : > { %v1497_v30 = vrot.slane %v1496_v29, 4 }
0x1701   : > { %v1498_v31 = vmax.f32 %v1496_v29, %v1497_v30 }
0x1703   : > { %v1499_v32 = vrot.slane %v1498_v31, 2 }
0x1705   : > { %v1500_v33 = vmax.f32 %v1498_v31, %v1499_v32 }
0x1707   : > { %v1501_v9 = vrot.slane %v1500_v33, 1 }
0x1709   : > { %v1502_v34 = vmax.f32 %v1500_v33, %v1501_v9 }
0x170b   : > { %v1503_v5 = vsub.f32 %v1492_v27, %v1502_v34 }
0x170d   : > { %v1504_v12 = vmul.f32 1.442695, %v1503_v5 }
0x170f   : > { %1929 = vpow2.f32 %v1504_v12 }
0x1719   : > { %v1930_v13 = vpop.eup %1929 }
0x171a   : > { %v1506_v35 = vsel %vm1495_vm6, %v1930_v13, 0.0 }
0x171b   : > { %v1507_v36 = vrot.slane %v1506_v35, 4 }
0x171d   : > { %v1508_v37 = vadd.f32 %v1507_v36, %v1506_v35 }
0x171f   : > { %v1509_v38 = vrot.slane %v1508_v37, 2 }
0x1721   : > { %v1510_v39 = vadd.f32 %v1509_v38, %v1508_v37 }
0x1723   : > { %v1511_v40 = vrot.slane %v1510_v39, 1 }
0x1725   : > { %v1512_v41 = vadd.f32 %v1511_v40, %v1510_v39 }
0x1727   : > { %1931 = vrcp.f32 %v1512_v41 }
0x1731   : > { %v1932_v42 = vpop.eup %1931 }
0x1732   : > { %v1514_v43 = vmul.f32 %v1932_v42, %v1930_v13 }
0x1734   : > { %1515 = vst.msk [vmem:[#allocation6] sm:$0x3] %vm1495_vm6, %v1514_v43 }
0x1735 PF: > { %p1827_p10 = scmp.eq.s32.totalorder %s2047_s24, 1  ;;  %s1998_s20 = smov [#allocation6]  }
0x1736   : > { %s1523_s21 = sshll.u32 %s1998_s20, 4  ;;  %s1524_s21 = int_to_ptr.vmem [resolvable:$true] %s1523_s21 }
0x1737   : > { %s1933_s23 = scalar_lea.vmem %s1524_s21, 32  ;;  %p1940_p0 = scmp.lt.s32.totalorder %s1524_s21, %s1524_s21 }
0x1738   : > { %p1934_p11 = scmp.ne.s32.totalorder %s1524_s21, %s1933_s23  ;;  %p1941_p1 = scmp.lt.s32.totalorder %s1933_s23, %s1933_s23 }
0x173a   : > { %p1935_p12 = pnand %p1934_p11, %p1827_p10  ;;  %p1942_p2 = por %p1941_p1, %p1940_p0 }
0x173c   : > { %p1936_p13 = pneg %p1935_p12 }
0x173e   : > { %p1943_p3 = pnand %p1942_p2, %p1936_p13 }
0x1740   : > { %1946 = shalt.err (!%p1943_p3)
}
0x1741   : > { %s1947_s29 = scalar_lea.hbm %s2240_s6, 32 }
0x1742   : > { %p1948_p4 = scmp.ne.s32.totalorder %s2240_s6, %s1947_s29  ;;  %p1953_p7 = scmp.lt.u32.totalorder %s1947_s29, %s2240_s6 }
0x1744   : > { %p1949_p5 = pnand %p1948_p4, %p1827_p10 }
0x1746   : > { %p1950_p6 = pneg %p1949_p5 }
0x1748   : > { %p1955_p8 = pnand %p1953_p7, %p1950_p6 }
0x174a   : > { %1958 = shalt.err (!%p1955_p8)
}
0x174b   : > { %1824 = dma.vmem_to_hbm [thread:$0]  (%p1827_p10), %s1524_s21, 32, %s2240_s6, [#allocation7]  }
0x174c   : > { %1972 = dma.done.wait (%p1827_p10), [#allocation7], 32  }
0x174d   : > { %1974 = vsyncadd (%p1827_p10), [#allocation7], 4294967264 }
0x174e PF: > { %p14_p9 = scmp.ge.s32.totalorder %s2049_s25, 4   ;;  %s2241_s21 = smov %s1981_s22 }
0x174f   : > { %s2242_s22 = smov %s2056_s28  ;;  %s2243_s23 = smov %s2049_s25 }
0x1750   :  { %16 = sbr.rel (!%p14_p9) target bundleno = 2 (0x2), region = 130 }
0x1757   :  { %1536 = vsyncpa [#allocation7], 1 }
0x1758   :  { %1538 = vsyncpa [#allocation7 + $0x1], 1 }

</bundles_post_ra>
